<compile_context>
chip_gen: v6e
topology: v6e:2x2x1
jax: 0.10.0
libtpu: 0.0.40
codegen_flags: <defaults>
</compile_context>

<pallas_src>
import jax
import jax.numpy as jnp
from jax.experimental import pallas as pl
from jax.experimental.pallas import tpu as pltpu


def _round_up(x, m):
    return (x + m - 1) // m * m


def spm_mlp_kernel(x_ref, w1_ref, b1_ref, w2_ref, b2_ref, out_ref):
    # x_ref:  (TB, 1)       float32
    # w1_ref: (1, 32)       float32
    # b1_ref: (1, 32)       float32
    # w2_ref: (32, OUT_P)   float32   (OUT_P = OUT padded to a multiple of 128)
    # b2_ref: (1, OUT_P)    float32
    # out_ref:(TB, OUT_P)   float32
    x = x_ref[...]
    # Layer 1: rank-1 "matmul" done on the VPU (broadcast mul+add), not the MXU.
    h = jnp.maximum(x * w1_ref[...] + b1_ref[...], 0.0)          # (TB, 32)
    # Layer 2: real contraction (K=32) on the MXU, f32 accumulation.
    y = jnp.dot(h, w2_ref[...], preferred_element_type=jnp.float32) + b2_ref[...]
    out_ref[...] = y.astype(out_ref.dtype)


def spm_forward(x, w1, b1, w2, b2, num_virtual_tokens, *, batch_tile=512):
    """x: [B, 1] -> output: [B, T, output_dim // T]."""
    batch = x.shape[0]
    out_dim = w2.shape[1]
    hidden = w2.shape[0]
    assert out_dim % num_virtual_tokens == 0, "output_dim must divide by T"
    assert batch_tile % 8 == 0

    # Lane-dense output: pad OUT to a multiple of 128 (zeros -> padded columns
    # produce zeros, sliced off below). Sublane-align batch to 8.
    out_p = _round_up(out_dim, 128)
    b_p = _round_up(batch, 8)
    if out_p != out_dim:
        w2 = jnp.pad(w2, ((0, 0), (0, out_p - out_dim)))
        b2 = jnp.pad(b2, ((0, 0), (0, out_p - out_dim)))
    if b_p != batch:
        x = jnp.pad(x, ((0, b_p - batch), (0, 0)))

    cost = pl.CostEstimate(
        flops=2 * b_p * hidden * out_p,
        transcendentals=0,
        bytes_accessed=(b_p + 2 * hidden + hidden * out_p + out_p + b_p * out_p) * 4,
    )

    if b_p <= batch_tile:
        # Small batch: single un-gridded call; no grid-step / pipeline overhead.
        out = pl.pallas_call(
            spm_mlp_kernel,
            out_shape=jax.ShapeDtypeStruct((b_p, out_p), jnp.float32),
            in_specs=[pl.BlockSpec(memory_space=pltpu.MemorySpace.VMEM)] * 5,
            out_specs=pl.BlockSpec(memory_space=pltpu.MemorySpace.VMEM),
            cost_estimate=cost,
        )(x, w1, b1, w2, b2)
    else:
        # Large batch: tile over B, weights stay resident across the grid,
        # batch axis "parallel" so v7x's two TensorCores split it.
        # TODO(synk): for B in the many-thousands also pass x lane-dense
        # ((B/128,128)) instead of (B,1) to avoid the tiny-stride DMA.
        tb = batch_tile
        b_pg = _round_up(b_p, tb)
        if b_pg != b_p:
            x = jnp.pad(x, ((0, b_pg - b_p), (0, 0)))
        out = pl.pallas_call(
            spm_mlp_kernel,
            out_shape=jax.ShapeDtypeStruct((b_pg, out_p), jnp.float32),
            grid_spec=pltpu.PrefetchScalarGridSpec(
                num_scalar_prefetch=0,
                grid=(b_pg // tb,),
                in_specs=[
                    pl.BlockSpec((tb, 1), lambda i: (i, 0)),
                    pl.BlockSpec((1, hidden), lambda i: (0, 0)),
                    pl.BlockSpec((1, hidden), lambda i: (0, 0)),
                    pl.BlockSpec((hidden, out_p), lambda i: (0, 0)),
                    pl.BlockSpec((1, out_p), lambda i: (0, 0)),
                ],
                out_specs=pl.BlockSpec((tb, out_p), lambda i: (i, 0)),
            ),
            compiler_params=pltpu.CompilerParams(
                dimension_semantics=("parallel",),
            ),
            cost_estimate=cost,
        )(x, w1, b1, w2, b2)

    out = out[:batch, :out_dim]
    # output.view(batch_size, num_virtual_tokens, -1)
    return out.reshape(batch, num_virtual_tokens, out_dim // num_virtual_tokens)


def init_spm_params(key, num_layers, token_dim, num_heads):
    """Deterministic init mirroring nn.Linear default (uniform +/- 1/sqrt(fan_in))."""
    output_dim = num_layers * 2 * (token_dim // num_heads)
    k1, k2, k3, k4 = jax.random.split(key, 4)

    bound1 = 1.0 / jnp.sqrt(1.0)   # fan_in = 1
    w1 = jax.random.uniform(k1, (1, 32), jnp.float32, -bound1, bound1)
    b1 = jax.random.uniform(k2, (1, 32), jnp.float32, -bound1, bound1)

    bound2 = 1.0 / jnp.sqrt(32.0)  # fan_in = 32
    w2 = jax.random.uniform(k3, (32, output_dim), jnp.float32, -bound2, bound2)
    b2 = jax.random.uniform(k4, (1, output_dim), jnp.float32, -bound2, bound2)
    return w1, b1, w2, b2


def _ref(x, w1, b1, w2, b2, T):
    y = jnp.maximum(x @ w1 + b1, 0.0) @ w2 + b2
    return y.reshape(x.shape[0], T, -1)


if __name__ == "__main__":
    # Small config: L=4 layers, D=32 token dim, H=4 heads, T=1 virtual token
    num_layers, token_dim, num_heads, num_virtual_tokens = 4, 32, 4, 1
    out_dim = num_layers * 2 * (token_dim // num_heads)   # 64

    key = jax.random.PRNGKey(0)
    kx, kp, kx2 = jax.random.split(key, 3)
    w1, b1, w2, b2 = init_spm_params(kp, num_layers, token_dim, num_heads)

    # --- small-batch (ungridded) path ---
    batch = 8
    x = jax.random.normal(kx, (batch, 1), jnp.float32)
    out = jax.block_until_ready(
        spm_forward(x, w1, b1, w2, b2, num_virtual_tokens))
    ref = _ref(x, w1, b1, w2, b2, num_virtual_tokens)
    assert out.shape == (batch, num_virtual_tokens, out_dim)
    assert jnp.allclose(out, ref, atol=1e-5, rtol=1e-5)

    # --- large-batch (gridded, weights-resident, parallel) path ---
    batch2 = 600  # > batch_tile and not a multiple of the tile -> exercises padding
    x2 = jax.random.normal(kx2, (batch2, 1), jnp.float32)
    out2 = jax.block_until_ready(
        spm_forward(x2, w1, b1, w2, b2, num_virtual_tokens, batch_tile=512))
    ref2 = _ref(x2, w1, b1, w2, b2, num_virtual_tokens)
    assert out2.shape == (batch2, num_virtual_tokens, out_dim)
    assert jnp.allclose(out2, ref2, atol=1e-5, rtol=1e-5)

    print("KERNEL_OK")
</pallas_src>

<mosaic_0001>
module attributes {stable_mosaic.version = 11 : i64} {
  func.func @spm_mlp_kernel(%arg0: memref<8x1xf32, #tpu.memory_space<vmem>>, %arg1: memref<1x32xf32, #tpu.memory_space<vmem>>, %arg2: memref<1x32xf32, #tpu.memory_space<vmem>>, %arg3: memref<32x128xf32, #tpu.memory_space<vmem>>, %arg4: memref<1x128xf32, #tpu.memory_space<vmem>>, %arg5: memref<8x128xf32, #tpu.memory_space<vmem>>) attributes {dimension_semantics = [], scalar_prefetch = 0 : i64, scratch_operands = 0 : i64, tpu.core_type = #tpu.core_type<tc>} {
    %c0 = arith.constant 0 : index
    %c0_0 = arith.constant 0 : index
    %0 = vector.load %arg0[%c0, %c0_0] : memref<8x1xf32, #tpu.memory_space<vmem>>, vector<8x1xf32>
    %c0_1 = arith.constant 0 : index
    %c0_2 = arith.constant 0 : index
    %1 = vector.load %arg1[%c0_1, %c0_2] : memref<1x32xf32, #tpu.memory_space<vmem>>, vector<1x32xf32>
    %2 = vector.broadcast %0 : vector<8x1xf32> to vector<8x32xf32>
    %3 = vector.broadcast %1 : vector<1x32xf32> to vector<8x32xf32>
    %4 = arith.mulf %2, %3 : vector<8x32xf32>
    %c0_3 = arith.constant 0 : index
    %c0_4 = arith.constant 0 : index
    %5 = vector.load %arg2[%c0_3, %c0_4] : memref<1x32xf32, #tpu.memory_space<vmem>>, vector<1x32xf32>
    %6 = vector.broadcast %5 : vector<1x32xf32> to vector<8x32xf32>
    %7 = arith.addf %4, %6 : vector<8x32xf32>
    %cst = arith.constant 0.000000e+00 : f32
    %8 = vector.broadcast %cst : f32 to vector<8x32xf32>
    %9 = arith.maximumf %7, %8 : vector<8x32xf32>
    %c0_5 = arith.constant 0 : index
    %c0_6 = arith.constant 0 : index
    %10 = vector.load %arg3[%c0_5, %c0_6] : memref<32x128xf32, #tpu.memory_space<vmem>>, vector<32x128xf32>
    %cst_7 = arith.constant dense<0.000000e+00> : vector<8x128xf32>
    %11 = tpu.matmul %9, %10, %cst_7 {dimension_numbers = #tpu.dot_dimension_numbers<[1], [0], [0], [1], [0, 0, 1, 1], [], []>} : vector<8x32xf32>, vector<32x128xf32>, vector<8x128xf32> -> vector<8x128xf32>
    %c0_8 = arith.constant 0 : index
    %c0_9 = arith.constant 0 : index
    %12 = vector.load %arg4[%c0_8, %c0_9] : memref<1x128xf32, #tpu.memory_space<vmem>>, vector<1x128xf32>
    %13 = vector.broadcast %12 : vector<1x128xf32> to vector<8x128xf32>
    %14 = arith.addf %11, %13 : vector<8x128xf32>
    %c0_10 = arith.constant 0 : index
    %c0_11 = arith.constant 0 : index
    %15 = vector.load %arg5[%c0_10, %c0_11] : memref<8x128xf32, #tpu.memory_space<vmem>>, vector<8x128xf32>
    tpu.vector_store %arg5[%c0_10, %c0_11], %14 {strides = array<i32>} : memref<8x128xf32, #tpu.memory_space<vmem>>, vector<8x128xf32>,
    return
  }
}

</mosaic_0001>

<bundles_post_ra>
// kernel: tpu_custom_call.1
= control target key start
LH: loop header
LB: loop body
LE: loop exit
PB: predicated region body
PF: predicated region fallthrough
CT: control target
= control target key end

     0   :  { %10 = vsyncpa [#allocation3], 0  ;;  %s286_s0 = inlined_call_operand.vmem [shape: f32[8,1], index: 0, kind: input, shape index: {}]   ;;  %s287_s1 = inlined_call_operand.vmem [shape: f32[1,32], index: 1, kind: input, shape index: {}]   ;;  %s288_s2 = inlined_call_operand.vmem [shape: f32[1,32], index: 2, kind: input, shape index: {}]   ;;  %s289_s3 = inlined_call_operand.hbm [shape: f32[32,128], index: 3, kind: input, shape index: {}]   ;;  %s290_s4 = inlined_call_operand.vmem [shape: f32[1,128], index: 4, kind: input, shape index: {}]   ;;  %s291_s5 = inlined_call_operand.hbm [shape: f32[8,128], index: 5, kind: output, shape index: {}]  }
   0x1   :  { %11 = vsyncpa [#allocation4], 0  ;;  %s231_s18 = smov [#allocation2]  }
   0x2   :  { %s23_s19 = sshll.u32 %s231_s18, 4  ;;  %s24_s19 = int_to_ptr.vmem [resolvable:$true] %s23_s19 }
   0x3   :  { %s195_s20 = scalar_lea.vmem %s24_s19, 512  ;;  %p200_p1 = scmp.lt.s32.totalorder %s24_s19, %s24_s19 }
   0x4   :  { %p196_p0 = scmp.ne.s32.totalorder %s24_s19, %s195_s20  ;;  %p201_p2 = scmp.lt.s32.totalorder %s195_s20, %s195_s20 }
   0x6   :  { %p202_p3 = por %p201_p2, %p200_p1 }
   0x8   :  { %p203_p4 = pnand %p202_p3, %p196_p0 }
   0xa   :  { %206 = shalt.err (!%p203_p4)
}
   0xb   :  { %s232_s21 = smov 128   ;;  %s233_s22 = smov 8  }
   0xc   :  { %29 = dma.hbm_to_vmem [thread:$0]  %s289_s3, 512, %s24_s19, [#allocation3], %s232_s21, %s232_s21, %s233_s22  }
   0xd   :  { %227 = dma.done.wait [#allocation3], 512  }
   0xe   :  { %228 = vsyncadd [#allocation3], 4294966784  ;;  %v234_v0 = vmov 0   ;;  %v235_v1 = vmov 0.0   ;;  %v35_v2 = vld [vmem:[%s286_s0] sm:$0xff]  ;;  %v61_v3 = vld [vmem:[#allocation2 + $0x18] sm:$0xff] }
   0xf   :  { %186 = vset.pattern.permute.xlu0 %v234_v0  ;;  %168 = vmatprep.subr.mxu0 %v235_v1  ;;  %v60_v4 = vld [vmem:[#allocation2 + $0x10] sm:$0xff]  ;;  %v59_v5 = vld [vmem:[#allocation2 + $0x8] sm:$0xff]  ;;  %vm236_vm0 = vmmov 0   ;;  %v58_v6 = vld [vmem:[#allocation2] sm:$0xff]  ;;  %vm69_vm1 = vcmask 261120   ;;  %s237_s6 = smov [#allocation5]  }
  0x10   :  { %39 = vperm.xlu0 %186, %v35_v2   ;;  %169 = vmatpush3.msra.mxu0 %v61_v3  ;;  %v159_v7 = vld [vmem:[%s287_s1] ss:$0 sm:$0xff]  ;;  %s150_s7 = sshll.u32 %s237_s6, 4  ;;  %s151_s7 = int_to_ptr.vmem [resolvable:$true] %s150_s7 }
  0x11   :  { %170 = vmatprep.subr.mxu0 %v235_v1  ;;  %176 = vmatprep.mubr.msk.f32.mxu0 %vm236_vm0, %v235_v1  ;;  %v160_v8 = vld [vmem:[%s288_s2] ss:$0 sm:$0xff]  ;;  %s207_s1 = scalar_lea.vmem %s151_s7, 128  ;;  %p212_p6 = scmp.lt.s32.totalorder %s151_s7, %s151_s7 }
  0x12   :  { %171 = vmatpush3.msra.mxu0 %v60_v4  ;;  %v161_v13 = vld [vmem:[%s290_s4] ss:$0 sm:$0xff]  ;;  %p208_p5 = scmp.ne.s32.totalorder %s151_s7, %s207_s1  ;;  %p213_p7 = scmp.lt.s32.totalorder %s207_s1, %s207_s1 }
  0x13   :  { %172 = vmatprep.subr.mxu0 %v235_v1 }
  0x14   :  { %173 = vmatpush3.msra.mxu0 %v59_v5  ;;  %p214_p8 = por %p213_p7, %p212_p6 }
  0x15   :  { %174 = vmatprep.subr.mxu0 %v235_v1 }
  0x16   :  { %175 = vmatpush3.msra.mxu0 %v58_v6  ;;  %p215_p9 = pnand %p214_p8, %p208_p5 }
  0x8b   :  { %v40_v9 = vpop.permute.xlu0 %39 }
  0x8c   :  { %v48_v10 = vmul.f32 %v159_v7, %v40_v9 }
  0x8e   :  { %v56_v11 = vadd.f32 %v160_v8, %v48_v10 }
  0x90   :  { %v57_v12 = vmax.f32 %v56_v11, 0.0 }
  0x92   :  { %177 = vmatmul.mubr.msk.f32.vlgmr.msra.gmra.mxu0 %vm69_vm1, %v57_v12 }
 0x152   :  { %v139_v14 = vpop.f32.mrf.mxu0 }
 0x153   :  { %v140_v15 = vadd.f32 %v161_v13, %v139_v14 }
 0x154   :  { %v178_v16 = vpop.f32.mrf.mxu0 }
 0x155   :  { %143 = vst [vmem:[#allocation5] sm:$0xff] %v140_v15 }
 0x156   :  { %218 = shalt.err (!%p215_p9)
}
 0x157   :  { %153 = dma.vmem_to_hbm [thread:$0]  %s151_s7, 128, %s291_s5, [#allocation4]  }
 0x158   :  { %229 = dma.done.wait [#allocation4], 128  }
 0x159   :  { %230 = vsyncadd [#allocation4], 4294967168 }
 0x15a   :  { %157 = vsyncpa [#allocation3], 1 }
 0x15b   :  { %158 = vsyncpa [#allocation4], 1 }

</bundles_post_ra>
